<compile_context>
chip_gen: v6e
topology: v6e:2x2x1
jax: 0.10.0
libtpu: 0.0.40
codegen_flags: <defaults>
</compile_context>

<pallas_src>
import functools

import jax
import jax.numpy as jnp
from jax import lax
from jax.experimental import pallas as pl
from jax.experimental.pallas import tpu as pltpu


def mlp_kernel(x_ref, w_in_ref, b_in_ref, w_h_ref, b_h_ref, w_out_ref,
               b_out_ref, o_ref, *, n_hidden, mxu_dtype):
    # x_ref:     (2, TB)          batch on lanes
    # w_in_ref:  (width, 2)       PyTorch (out, in) layout
    # b_in_ref:  (width, 1)
    # w_h_ref:   (n_hidden, width, width)
    # b_h_ref:   (n_hidden, width, 1)
    # w_out_ref: (width, 1)
    # b_out_ref: (1,) in SMEM
    # o_ref:     (1, TB)
    x = x_ref[...]
    w_in = w_in_ref[...]

    # --- input layer (K=2): broadcast-FMAs on the VPU, MXU stays idle ------
    h = (w_in[:, 0:1] * x[0:1, :]
         + w_in[:, 1:2] * x[1:2, :]
         + b_in_ref[...])                       # (width, TB)
    h = jnp.tanh(h)

    # --- hidden layers: h = tanh(W_h[i] @ h + b_h[i]) on the MXU ------------
    def layer(i, h):
        lhs = w_h_ref[i]
        rhs = h
        if mxu_dtype != jnp.float32:            # v6e/v7x: bf16 MXU operands
            lhs = lhs.astype(mxu_dtype)
            rhs = rhs.astype(mxu_dtype)
        hh = jnp.dot(lhs, rhs, preferred_element_type=jnp.float32)
        return jnp.tanh(hh + b_h_ref[i])

    if n_hidden <= 4:
        # shallow nets: static unroll is simplest and fully visible to LLO
        for i in range(n_hidden):
            h = layer(i, h)
    else:
        # deep nets: unrolled fori_loop keeps the body visible to the LLO
        # scheduler (rolled short loops are documented ~-35%) while bounding
        # trace size vs. a full static unroll.
        h = lax.fori_loop(0, n_hidden, layer, h, unroll=True)

    # --- output layer (N=1): VPU multiply + XLU sublane reduction ----------
    o_ref[...] = (jnp.sum(h * w_out_ref[...], axis=0, keepdims=True)
                  + b_out_ref[0])


def _pick_tile_b(B):
    """Lane-dense batch tile: as large as vreg pressure allows (<=512), but
    keep >= 2 'parallel' grid steps when the batch permits (v7x: 2 TCs)."""
    for tb in (512, 384, 256, 128):
        if pl.cdiv(B, tb) >= 2:
            return tb
    return 128


def net_forward(x, params, *, tile_b=None, mxu_dtype=jnp.float32):
    """MLP forward pass.  x: (B, 2) float32 -> (B, 1) float32."""
    w_in, b_in, w_h, b_h, w_out, b_out = params
    B, in_dim = x.shape
    width = w_in.shape[0]
    n_hidden = w_h.shape[0]
    assert in_dim == 2
    assert n_hidden >= 1, "kernel expects depth >= 2 (at least one hidden layer)"
    if tile_b is None:
        tile_b = _pick_tile_b(B)
    assert tile_b % 128 == 0, "keep the batch tile lane-dense"

    # Batch on lanes.  Avoid the zero-fill + scatter pass: plain transpose
    # when the batch divides the tile, a single pad otherwise.
    n_tiles = pl.cdiv(B, tile_b)
    b_pad = n_tiles * tile_b
    x_t = x.T
    if b_pad != B:
        x_t = jnp.pad(x_t, ((0, 0), (0, b_pad - B)))

    kernel = functools.partial(mlp_kernel, n_hidden=n_hidden,
                               mxu_dtype=mxu_dtype)

    # NOTE: weight/bias blocks have constant index_maps; at width=32 their
    # double-buffered VMEM cost is ~18 KiB (negligible).  See TODO(synk)
    # above for the large-width streaming plan.
    out_t = pl.pallas_call(
        kernel,
        out_shape=jax.ShapeDtypeStruct((1, b_pad), jnp.float32),
        grid_spec=pltpu.PrefetchScalarGridSpec(
            num_scalar_prefetch=0,
            grid=(n_tiles,),
            in_specs=[
                pl.BlockSpec((in_dim, tile_b), lambda i: (0, i)),      # x^T
                pl.BlockSpec((width, in_dim), lambda i: (0, 0)),       # W_in
                pl.BlockSpec((width, 1), lambda i: (0, 0)),            # b_in
                pl.BlockSpec((n_hidden, width, width),
                             lambda i: (0, 0, 0)),                     # W_h
                pl.BlockSpec((n_hidden, width, 1),
                             lambda i: (0, 0, 0)),                     # b_h
                pl.BlockSpec((width, 1), lambda i: (0, 0)),            # W_out
                pl.BlockSpec(memory_space=pltpu.MemorySpace.SMEM),     # b_out
            ],
            out_specs=pl.BlockSpec((1, tile_b), lambda i: (0, i)),
        ),
        compiler_params=pltpu.CompilerParams(
            dimension_semantics=("parallel",)),
    )(x_t, w_in, b_in, w_h, b_h, w_out, b_out)

    return out_t[:, :B].T                       # (B, 1)


def init_params(key, width, depth):
    """Deterministic init mimicking PyTorch Linear default (U(+-1/sqrt(fan_in))).

    Weights are stored in PyTorch's native (out, in) layout (what the
    transposed batch-on-lanes kernel wants directly)."""
    n_hidden = depth - 1
    ks = jax.random.split(key, 6)

    def unif(k, shape, fan_in):
        bound = 1.0 / jnp.sqrt(fan_in)
        return jax.random.uniform(k, shape, jnp.float32, -bound, bound)

    w_in = unif(ks[0], (width, 2), 2.0)
    b_in = unif(ks[1], (width, 1), 2.0)
    w_h = unif(ks[2], (n_hidden, width, width), float(width))
    b_h = unif(ks[3], (n_hidden, width, 1), float(width))
    w_out = unif(ks[4], (width, 1), float(width))
    b_out = unif(ks[5], (1,), float(width))
    return (w_in, b_in, w_h, b_h, w_out, b_out)


def net_forward_ref(x, params):
    """Pure-JAX reference for correctness checking (PyTorch semantics)."""
    w_in, b_in, w_h, b_h, w_out, b_out = params
    h = jnp.tanh(x @ w_in.T + b_in[:, 0])
    for i in range(w_h.shape[0]):
        h = jnp.tanh(h @ w_h[i].T + b_h[i, :, 0])
    return h @ w_out + b_out


if __name__ == "__main__":
    width = 32
    depth = 3        # input layer + (depth-1)=2 hidden layers + output layer
    batch = 512      # auto tile_b=256 -> 2 lane-dense "parallel" grid steps

    key = jax.random.PRNGKey(0)
    kx, kp = jax.random.split(key)
    x = jax.random.normal(kx, (batch, 2), dtype=jnp.float32)
    params = init_params(kp, width, depth)

    # f32 MXU/tanh path (exact vs. reference).  On v6e/v7x pass
    # mxu_dtype=jnp.bfloat16 for ~2x step-time if tolerance allows.
    out = net_forward(x, params)
    out = jax.block_until_ready(out)

    ref = net_forward_ref(x, params)
    assert out.shape == (batch, 1)
    assert jnp.allclose(out, ref, atol=1e-5, rtol=1e-5)

    print("KERNEL_OK")
</pallas_src>

<mosaic_0001>
module attributes {stable_mosaic.version = 11 : i64} {
  func.func @mlp_kernel(%arg0: i32, %arg1: memref<2x384xf32, #tpu.memory_space<vmem>>, %arg2: memref<32x2xf32, #tpu.memory_space<vmem>>, %arg3: memref<32x1xf32, #tpu.memory_space<vmem>>, %arg4: memref<2x32x32xf32, #tpu.memory_space<vmem>>, %arg5: memref<2x32x1xf32, #tpu.memory_space<vmem>>, %arg6: memref<32x1xf32, #tpu.memory_space<vmem>>, %arg7: memref<1xf32, #tpu.memory_space<smem>>, %arg8: memref<1x384xf32, #tpu.memory_space<vmem>>) attributes {dimension_semantics = [#tpu.dimension_semantics<parallel>], iteration_bounds = array<i64: 2>, scalar_prefetch = 0 : i64, scratch_operands = 0 : i64, tpu.core_type = #tpu.core_type<tc>, window_params = [{transform_indices = @transform_0, window_bounds = array<i64: 2, 384>}, {pipeline_mode = #tpu.pipeline_mode<synchronous>, transform_indices = @transform_1, window_bounds = array<i64: 32, 2>}, {pipeline_mode = #tpu.pipeline_mode<synchronous>, transform_indices = @transform_2, window_bounds = array<i64: 32, 1>}, {pipeline_mode = #tpu.pipeline_mode<synchronous>, transform_indices = @transform_3, window_bounds = array<i64: 2, 32, 32>}, {pipeline_mode = #tpu.pipeline_mode<synchronous>, transform_indices = @transform_4, window_bounds = array<i64: 2, 32, 1>}, {pipeline_mode = #tpu.pipeline_mode<synchronous>, transform_indices = @transform_5, window_bounds = array<i64: 32, 1>}, {transform_indices = @transform_6, window_bounds = array<i64: 1>}, {transform_indices = @transform_7, window_bounds = array<i64: 1, 384>}]} {
    %c0 = arith.constant 0 : index
    %c0_0 = arith.constant 0 : index
    %0 = vector.load %arg1[%c0, %c0_0] : memref<2x384xf32, #tpu.memory_space<vmem>>, vector<2x384xf32>
    %c0_1 = arith.constant 0 : index
    %c0_2 = arith.constant 0 : index
    %1 = vector.load %arg2[%c0_1, %c0_2] : memref<32x2xf32, #tpu.memory_space<vmem>>, vector<32x2xf32>
    %2 = vector.extract_strided_slice %1 {offsets = [0, 0], sizes = [32, 1], strides = [1, 1]} : vector<32x2xf32> to vector<32x1xf32>
    %3 = vector.extract_strided_slice %0 {offsets = [0, 0], sizes = [1, 384], strides = [1, 1]} : vector<2x384xf32> to vector<1x384xf32>
    %4 = vector.broadcast %2 : vector<32x1xf32> to vector<32x384xf32>
    %5 = vector.broadcast %3 : vector<1x384xf32> to vector<32x384xf32>
    %6 = arith.mulf %4, %5 : vector<32x384xf32>
    %7 = vector.extract_strided_slice %1 {offsets = [0, 1], sizes = [32, 1], strides = [1, 1]} : vector<32x2xf32> to vector<32x1xf32>
    %8 = vector.extract_strided_slice %0 {offsets = [1, 0], sizes = [1, 384], strides = [1, 1]} : vector<2x384xf32> to vector<1x384xf32>
    %9 = vector.broadcast %7 : vector<32x1xf32> to vector<32x384xf32>
    %10 = vector.broadcast %8 : vector<1x384xf32> to vector<32x384xf32>
    %11 = arith.mulf %9, %10 : vector<32x384xf32>
    %12 = arith.addf %6, %11 : vector<32x384xf32>
    %c0_3 = arith.constant 0 : index
    %c0_4 = arith.constant 0 : index
    %13 = vector.load %arg3[%c0_3, %c0_4] : memref<32x1xf32, #tpu.memory_space<vmem>>, vector<32x1xf32>
    %14 = vector.broadcast %13 : vector<32x1xf32> to vector<32x384xf32>
    %15 = arith.addf %12, %14 : vector<32x384xf32>
    %16 = math.tanh %15 : vector<32x384xf32>
    %c0_5 = arith.constant 0 : index
    %c0_6 = arith.constant 0 : index
    %c0_7 = arith.constant 0 : index
    %17 = vector.load %arg4[%c0_5, %c0_6, %c0_7] : memref<2x32x32xf32, #tpu.memory_space<vmem>>, vector<1x32x32xf32>
    %18 = vector.shape_cast %17 : vector<1x32x32xf32> to vector<32x32xf32>
    %cst = arith.constant dense<0.000000e+00> : vector<32x384xf32>
    %19 = tpu.matmul %18, %16, %cst {dimension_numbers = #tpu.dot_dimension_numbers<[1], [0], [0], [1], [0, 0, 1, 1], [], []>} : vector<32x32xf32>, vector<32x384xf32>, vector<32x384xf32> -> vector<32x384xf32>
    %c0_8 = arith.constant 0 : index
    %c0_9 = arith.constant 0 : index
    %c0_10 = arith.constant 0 : index
    %20 = vector.load %arg5[%c0_8, %c0_9, %c0_10] : memref<2x32x1xf32, #tpu.memory_space<vmem>>, vector<1x32x1xf32>
    %21 = vector.shape_cast %20 : vector<1x32x1xf32> to vector<32x1xf32>
    %22 = vector.broadcast %21 : vector<32x1xf32> to vector<32x384xf32>
    %23 = arith.addf %19, %22 : vector<32x384xf32>
    %24 = math.tanh %23 : vector<32x384xf32>
    %c1 = arith.constant 1 : index
    %c0_11 = arith.constant 0 : index
    %c0_12 = arith.constant 0 : index
    %25 = vector.load %arg4[%c1, %c0_11, %c0_12] : memref<2x32x32xf32, #tpu.memory_space<vmem>>, vector<1x32x32xf32>
    %26 = vector.shape_cast %25 : vector<1x32x32xf32> to vector<32x32xf32>
    %cst_13 = arith.constant dense<0.000000e+00> : vector<32x384xf32>
    %27 = tpu.matmul %26, %24, %cst_13 {dimension_numbers = #tpu.dot_dimension_numbers<[1], [0], [0], [1], [0, 0, 1, 1], [], []>} : vector<32x32xf32>, vector<32x384xf32>, vector<32x384xf32> -> vector<32x384xf32>
    %c1_14 = arith.constant 1 : index
    %c0_15 = arith.constant 0 : index
    %c0_16 = arith.constant 0 : index
    %28 = vector.load %arg5[%c1_14, %c0_15, %c0_16] : memref<2x32x1xf32, #tpu.memory_space<vmem>>, vector<1x32x1xf32>
    %29 = vector.shape_cast %28 : vector<1x32x1xf32> to vector<32x1xf32>
    %30 = vector.broadcast %29 : vector<32x1xf32> to vector<32x384xf32>
    %31 = arith.addf %27, %30 : vector<32x384xf32>
    %32 = math.tanh %31 : vector<32x384xf32>
    %c0_17 = arith.constant 0 : index
    %c0_18 = arith.constant 0 : index
    %33 = vector.load %arg6[%c0_17, %c0_18] : memref<32x1xf32, #tpu.memory_space<vmem>>, vector<32x1xf32>
    %34 = vector.broadcast %33 : vector<32x1xf32> to vector<32x384xf32>
    %35 = arith.mulf %32, %34 : vector<32x384xf32>
    %cst_19 = arith.constant dense<0.000000e+00> : vector<384xf32>
    %36 = vector.multi_reduction <add>, %35, %cst_19 [0] : vector<32x384xf32> to vector<384xf32>
    %37 = vector.shape_cast %36 : vector<384xf32> to vector<1x384xf32>
    %c0_20 = arith.constant 0 : index
    %38 = memref.load %arg7[%c0_20] : memref<1xf32, #tpu.memory_space<smem>>
    %39 = vector.broadcast %38 : f32 to vector<1x384xf32>
    %40 = arith.addf %37, %39 : vector<1x384xf32>
    %c0_21 = arith.constant 0 : index
    %c0_22 = arith.constant 0 : index
    %41 = vector.load %arg8[%c0_21, %c0_22] : memref<1x384xf32, #tpu.memory_space<vmem>>, vector<1x384xf32>
    tpu.vector_store %arg8[%c0_21, %c0_22], %40 {strides = array<i32>} : memref<1x384xf32, #tpu.memory_space<vmem>>, vector<1x384xf32>,
    return
  }
  func.func @transform_0(%arg0: i32) -> (i32, i32) {
    %c0_i32 = arith.constant 0 : i32
    %c0_i32_0 = arith.constant 0 : i32
    return %c0_i32, %arg0 : i32, i32
  }
  func.func @transform_1(%arg0: i32) -> (i32, i32) {
    %c0_i32 = arith.constant 0 : i32
    %c0_i32_0 = arith.constant 0 : i32
    %c0_i32_1 = arith.constant 0 : i32
    return %c0_i32, %c0_i32_0 : i32, i32
  }
  func.func @transform_2(%arg0: i32) -> (i32, i32) {
    %c0_i32 = arith.constant 0 : i32
    %c0_i32_0 = arith.constant 0 : i32
    %c0_i32_1 = arith.constant 0 : i32
    return %c0_i32, %c0_i32_0 : i32, i32
  }
  func.func @transform_3(%arg0: i32) -> (i32, i32, i32) {
    %c0_i32 = arith.constant 0 : i32
    %c0_i32_0 = arith.constant 0 : i32
    %c0_i32_1 = arith.constant 0 : i32
    %c0_i32_2 = arith.constant 0 : i32
    return %c0_i32, %c0_i32_0, %c0_i32_1 : i32, i32, i32
  }
  func.func @transform_4(%arg0: i32) -> (i32, i32, i32) {
    %c0_i32 = arith.constant 0 : i32
    %c0_i32_0 = arith.constant 0 : i32
    %c0_i32_1 = arith.constant 0 : i32
    %c0_i32_2 = arith.constant 0 : i32
    return %c0_i32, %c0_i32_0, %c0_i32_1 : i32, i32, i32
  }
  func.func @transform_5(%arg0: i32) -> (i32, i32) {
    %c0_i32 = arith.constant 0 : i32
    %c0_i32_0 = arith.constant 0 : i32
    %c0_i32_1 = arith.constant 0 : i32
    return %c0_i32, %c0_i32_0 : i32, i32
  }
  func.func @transform_6(%arg0: i32) -> i32 {
    %c0_i32 = arith.constant 0 : i32
    %c0_i32_0 = arith.constant 0 : i32
    return %c0_i32 : i32
  }
  func.func @transform_7(%arg0: i32) -> (i32, i32) {
    %c0_i32 = arith.constant 0 : i32
    %c0_i32_0 = arith.constant 0 : i32
    return %c0_i32, %arg0 : i32, i32
  }
}

</mosaic_0001>

<bundles_post_ra>
// kernel: tpu_custom_call.1
= control target key start
LH: loop header
LB: loop body
LE: loop exit
PB: predicated region body
PF: predicated region fallthrough
CT: control target
= control target key end

     0   :  { %s1613_s0 = inlined_call_operand.vmem [shape: f32[2,768], index: 0, kind: input, shape index: {}]   ;;  %s1614_s1 = inlined_call_operand.vmem [shape: f32[32,2], index: 1, kind: input, shape index: {}]   ;;  %s1615_s2 = inlined_call_operand.vmem [shape: f32[32,1], index: 2, kind: input, shape index: {}]   ;;  %s1616_s3 = inlined_call_operand.vmem [shape: f32[2,32,32], index: 3, kind: input, shape index: {}]   ;;  %s1617_s4 = inlined_call_operand.vmem [shape: f32[2,32,1], index: 4, kind: input, shape index: {}]   ;;  %s1618_s5 = inlined_call_operand.vmem [shape: f32[32,1], index: 5, kind: input, shape index: {}]   ;;  %s1619_s6 = inlined_call_operand.<no memory space> [shape: f32[1], index: 6, kind: input, shape index: {}]   ;;  %s1620_s7 = inlined_call_operand.hbm [shape: f32[1,768], index: 7, kind: output, shape index: {}]  }
   0x1   :  { %12 = sst [smem:[#allocation2]] %s1619_s6 }
   0x2   :  { %13 = vsyncpa [#allocation4], 0 }
   0x3   :  { %15 = vsyncpa [#allocation4 + $0x1], 0  ;;  %s1400_s26 = smov 0   ;;  %s1402_s27 = smov 0  }
   0x4   :  { %s1404_s28 = smov 0   ;;  %s1406_s29 = smov 0  }
   0x5 LB: > { %s1421_s6 = sadd.s32 4294967295, %s1350_s29   ;;  %s1090_s30 = sadd.s32 4294967294, %s1350_s29   ;;  %s1350_s29 = sphi %s1406_s29, %s1626_s29   ;;  %s1346_s28 = sphi %s1404_s28, %s1625_s28   ;;  %s1342_s27 = sphi %s1402_s27, %s1624_s27   ;;  %s1338_s26 = sphi %s1400_s26, %s1623_s26  }
   0x6   : > { %s1425_s8 = sadd.s32 1, %s1350_s29   ;;  %s180_s9 = sadd.s32 1, %s1346_s28 }
   0x7   : > { %s177_s10 = ssub.s32 %s1350_s29, %s1425_s8  ;;  %p190_p0 = scmp.ne.s32.totalorder %s1346_s28, %s1342_s27 }
   0x8   : > { %p178_p1 = scmp.eq.s32.totalorder %s177_s10, 0  ;;  %p191_p2 = scmp.eq.s32.totalorder %s1421_s6, 1 }
   0x9   : > { %p196_p3 = scmp.ne.s32.totalorder %s1342_s27, %s1338_s26  ;;  %p197_p4 = scmp.eq.s32.totalorder %s1090_s30, 1 }
   0xa   : > { %s1436_s11 = scalar_select %p178_p1, %s1346_s28, %s180_s9  }
   0xb   : > { %p1438_p5 = por %p191_p2, %p190_p0  ;;  %p1442_p6 = por %p197_p4, %p196_p3 }
   0xc   : > { %p1093_p7 = scmp.ge.s32.totalorder %s1350_s29, 1  ;;  %p242_p8 = scmp.lt.s32.totalorder %s1350_s29, 3 }
   0xe   : > { %p243_p9 = pnand %p1093_p7, %p242_p8 }
   0xf   : > { %s274_s30 = smul.u32 (!%p243_p9), 3, %s1421_s6  ;;  %s271_s16 = sand.u32 (!%p243_p9), 1, %s1342_s27  }
  0x10   : > { %246 = sbr.rel (%p243_p9) target bundleno = 687 (0x2af), region = 48  ;;  %s1017_s24 = scalar_lea.sflag (!%p243_p9), [#allocation4], %s271_s16 }
  0x11   : > { %p275_p10 = scmp.lt.s32.totalorder (!%p243_p9), %s274_s30, 5  ;;  %s1167_s17 = smul.u32 (!%p243_p9), 3, %s271_s16 }
  0x12   : > { %s1122_s18 = smul.u32 (!%p243_p9), 48, %s1421_s6 }
  0x13   : > { %s273_s19 = scalar_lea.vmem (!%p243_p9), [#allocation3], %s1167_s17 }
  0x14   : > { %s1031_s20 = sshll.u32 (!%p243_p9), %s273_s19, 4  ;;  %s1029_s23 = scalar_lea.hbm (!%p243_p9), %s1620_s7, %s1122_s18  ;;  %s1032_s20 = int_to_ptr.vmem [resolvable:$true] %s1031_s20 }
  0x15   : > { %v285_v0 = vld [vmem:[%s1614_s1 + $0x18] sm:$0xff]  ;;  %v284_v1 = vld [vmem:[%s1614_s1 + $0x10] sm:$0xff]  ;;  %v1352_v2 = vmov 1   ;;  %v1353_v3 = vmov 0   ;;  %v283_v4 = vld [vmem:[%s1614_s1 + $0x8] sm:$0xff]  ;;  %vm489_vm0 = vcmask 261120   ;;  %v307_v24 = vlaneseq }
  0x16   : > { %1211 = vset.pattern.permute.xlu0 %v1352_v2  ;;  %1212 = vset.pattern.permute.xlu1 %v1353_v3  ;;  %v282_v5 = vld [vmem:[%s1614_s1] sm:$0xff]  ;;  %v416_v6 = vld [vmem:[%s1615_s2 + $0x18] sm:$0xff]  ;;  %v414_v7 = vld [vmem:[%s1615_s2 + $0x8] sm:$0xff]  ;;  %v1354_v21 = vmov 0.0   ;;  %s1628_s30 = smov (!%p275_p10, %s274_s30), 5  ;;  %s1290_s25 = scalar_lea.vmem %s1032_s20, 48 }
  0x17   : > { %359 = vperm.xlu0 %1211, %v285_v0   ;;  %298 = vperm.xlu1 %1212, %v284_v1   ;;  %v468_v8 = vld [vmem:[%s1617_s4 + $0x18] sm:$0xff]  ;;  %v415_v9 = vld [vmem:[%s1615_s2 + $0x10] sm:$0xff]  ;;  %v466_v10 = vld [vmem:[%s1617_s4 + $0x8] sm:$0xff]  ;;  %s1094_s9 = sshll.u32 %s1628_s30, 1  ;;  %v1518_v25 = vshrl.u32 %v307_v24, 7  ;;  %vm1013_vm1 = vcmp.lt.s32.totalorder %v307_v24, 384  ;;  %p1291_p11 = scmp.ne.s32.totalorder %s1032_s20, %s1290_s25 }
  0x18   : > { %v413_v11 = vld [vmem:[%s1615_s2] sm:$0xff]  ;;  %v467_v13 = vld [vmem:[%s1617_s4 + $0x10] sm:$0xff]  ;;  %v1108_v17 = vld [vmem:[%s1617_s4 + $0x28] sm:$0xff]  ;;  %566 = vmatprep.mubr.f32.mxu0 %v1354_v21  ;;  %s278_s15 = scalar_lea.vmem %s1613_s0, %s1094_s9  ;;  %s1356_s30 = smov [#allocation3]  }
  0x19   : > { %v1107_v12 = vld [vmem:[%s1617_s4 + $0x20] sm:$0xff]  ;;  %v1109_v14 = vld [vmem:[%s1617_s4 + $0x30] sm:$0xff]  ;;  %v1110_v19 = vld [vmem:[%s1617_s4 + $0x38] sm:$0xff]  ;;  %v364_v26 = vsub.s32 1, %v1518_v25  ;;  %v368_v27 = vsub.s32 3, %v1518_v25  ;;  %v372_v28 = vsub.s32 5, %v1518_v25  ;;  %p1292_p12 = pnand %p1291_p11, %p1438_p5 }
  0x1a   : > { %v465_v15 = vld [vmem:[%s1617_s4] sm:$0xff]  ;;  %v918_v18 = vld [vmem:[%s1618_s5 + $0x10] sm:$0xff]  ;;  %v917_v22 = vld [vmem:[%s1618_s5 + $0x8] sm:$0xff]  ;;  %v309_v29 = vsub.s32 0, %v1518_v25  ;;  %v313_v30 = vsub.s32 2, %v1518_v25  ;;  %v317_v31 = vsub.s32 4, %v1518_v25 }
  0x1b   : > { %1213 = vset.pattern.permute.xlu1 %v1352_v2  ;;  %351 = vperm.xlu0 %1211, %v283_v4   ;;  %v916_v16 = vld [vmem:[%s1618_s5] sm:$0xff]  ;;  %v919_v23 = vld [vmem:[%s1618_s5 + $0x18] sm:$0xff]  ;;  %p1293_p13 = pneg %p1292_p12  ;;  %s1294_s6 = sshll.u32 %s1356_s30, 4  ;;  %s1295_s6 = int_to_ptr.vmem [resolvable:$false] %s1294_s6 }
  0x1c   : > { %355 = vperm.xlu1 %1213, %v284_v1   ;;  %v1505_v20 = vld [vmem:[%s1616_s3] sm:$0xff]  ;;  %s1296_s9 = scalar_lea.vmem %s1295_s6, 96  ;;  %p1297_p0 = scmp.lt.s32.totalorder %s1032_s20, %s1295_s6 }
  0x1d   : > { %1147 = vmatprep.mubr.msk.f32.mxu1 %vm489_vm0, %v1505_v20  ;;  %v281_v33 = vld [vmem:[%s278_s15] sm:$0x3f]  ;;  %s979_s15 = sld [smem:[#allocation2]]  ;;  %p1298_p1 = scmp.lt.s32.totalorder %s1296_s9, %s1290_s25 }
  0x1e   : > { %v365_v35 = vrot.slane %v281_v33, %v364_v26  ;;  %v369_v36 = vrot.slane %v281_v33, %v368_v27  ;;  %v373_v37 = vrot.slane %v281_v33, %v372_v28  ;;  %v310_v38 = vrot.slane %v281_v33, %v309_v29 }
  0x1f   : > { %1215 = vset.pattern.permute.xlu0 %v1353_v3  ;;  %v314_v39 = vrot.slane %v281_v33, %v313_v30  ;;  %v318_v40 = vrot.slane %v281_v33, %v317_v31  ;;  %p1299_p2 = por %p1298_p1, %p1297_p0 }
  0x20   : > { %1214 = vset.pattern.permute.xlu1 %v1353_v3  ;;  %303 = vperm.xlu0 %1215, %v285_v0   ;;  %v380_v43 = vrot.slane %v365_v35, %v364_v26  ;;  %v384_v44 = vrot.slane %v369_v36, %v364_v26  ;;  %v388_v45 = vrot.slane %v373_v37, %v364_v26 }
  0x21   : > { %293 = vperm.xlu1 %1214, %v283_v4   ;;  %v325_v46 = vrot.slane %v310_v38, %v309_v29  ;;  %v329_v47 = vrot.slane %v314_v39, %v309_v29  ;;  %v333_v48 = vrot.slane %v318_v40, %v309_v29  ;;  %p1300_p3 = pnand %p1299_p2, %p1293_p13 }
  0x24   : > { %288 = vperm.xlu0 %1215, %v282_v5  }
  0x25   : > { %434 = vperm.xlu1 %1214, %v416_v6  }
  0x28   : > { %424 = vperm.xlu0 %1215, %v414_v7  }
  0x29   : > { %1216 = vset.pattern.permute.xlu1 %v1352_v2 }
  0x2a   : > { %347 = vperm.xlu1 %1216, %v282_v5  }
  0x2c   : > { %486 = vperm.xlu0 %1215, %v468_v8  }
  0x2e   : > { %1217 = vset.pattern.permute.xlu1 %v1353_v3 }
  0x2f   : > { %429 = vperm.xlu1 %1217, %v415_v9  }
  0x30   : > { %476 = vperm.xlu0 %1215, %v466_v10  }
  0x33   : > { %419 = vperm.xlu1 %1217, %v413_v11  }
  0x34   : > { %700 = vperm.xlu0 %1215, %v1107_v12  }
  0x37   : > { %481 = vperm.xlu1 %1217, %v467_v13  }
  0x38   : > { %710 = vperm.xlu0 %1215, %v1109_v14  }
  0x3b   : > { %471 = vperm.xlu1 %1217, %v465_v15  }
  0x3c   : > { %922 = vperm.xlu0 %1215, %v916_v16  }
  0x3f   : > { %705 = vperm.xlu1 %1217, %v1108_v17  }
  0x40   : > { %932 = vperm.xlu0 %1215, %v918_v18  }
  0x43   : > { %715 = vperm.xlu1 %1217, %v1110_v19  }
  0x47   : > { %927 = vperm.xlu1 %1217, %v917_v22  }
  0x4b   : > { %937 = vperm.xlu1 %1217, %v919_v23  }
  0x92   : > { %v299_v32 = vpop.permute.xlu1 %298  ;;  %v360_v34 = vpop.permute.xlu0 %359 }
  0x93   : > { %v398_v49 = vmul.f32 %v380_v43, %v360_v34  ;;  %v399_v50 = vmul.f32 %v384_v44, %v360_v34  ;;  %v400_v51 = vmul.f32 %v388_v45, %v360_v34  ;;  %v340_v9 = vmul.f32 %v325_v46, %v299_v32 }
  0x94   : > { %v341_v10 = vmul.f32 %v329_v47, %v299_v32  ;;  %v342_v13 = vmul.f32 %v333_v48, %v299_v32 }
  0x96   : > { %v352_v41 = vpop.permute.xlu0 %351 }
  0x97   : > { %v356_v42 = vpop.permute.xlu1 %355  ;;  %v392_v61 = vmul.f32 %v380_v43, %v352_v41  ;;  %v393_v3 = vmul.f32 %v384_v44, %v352_v41  ;;  %v394_v14 = vmul.f32 %v388_v45, %v352_v41 }
  0x98   : > { %v395_v5 = vmul.f32 %v380_v43, %v356_v42  ;;  %v396_v6 = vmul.f32 %v384_v44, %v356_v42  ;;  %v397_v7 = vmul.f32 %v388_v45, %v356_v42 }
  0x9a   : > { %v407_v18 = vadd.f32 %v395_v5, %v340_v9  ;;  %v408_v19 = vadd.f32 %v396_v6, %v341_v10  ;;  %v409_v27 = vadd.f32 %v397_v7, %v342_v13 }
  0x9b   : > { %v304_v52 = vpop.permute.xlu0 %303 }
  0x9c   : > { %v343_v53 = vmul.f32 %v325_v46, %v304_v52  ;;  %v344_v54 = vmul.f32 %v329_v47, %v304_v52  ;;  %v345_v55 = vmul.f32 %v333_v48, %v304_v52  ;;  %v294_v56 = vpop.permute.xlu1 %293 }
  0x9d   : > { %v337_v63 = vmul.f32 %v325_v46, %v294_v56  ;;  %v338_v4 = vmul.f32 %v329_v47, %v294_v56  ;;  %v339_v15 = vmul.f32 %v333_v48, %v294_v56 }
  0x9e   : > { %v410_v57 = vadd.f32 %v398_v49, %v343_v53  ;;  %v412_v58 = vadd.f32 %v400_v51, %v345_v55  ;;  %v411_v59 = vadd.f32 %v399_v50, %v344_v54 }
  0x9f   : > { %v289_v60 = vpop.permute.xlu0 %288  ;;  %v404_v11 = vadd.f32 %v392_v61, %v337_v63  ;;  %v405_v16 = vadd.f32 %v393_v3, %v338_v4  ;;  %v406_v33 = vadd.f32 %v394_v14, %v339_v15 }
  0xa0   : > { %v435_v62 = vpop.permute.xlu1 %434  ;;  %v334_v22 = vmul.f32 %v325_v46, %v289_v60  ;;  %v335_v23 = vmul.f32 %v329_v47, %v289_v60  ;;  %v336_v28 = vmul.f32 %v333_v48, %v289_v60 }
  0xa1   : > { %v446_v0 = vadd.f32 %v435_v62, %v410_v57  ;;  %v448_v1 = vadd.f32 %v435_v62, %v412_v58  ;;  %v447_v2 = vadd.f32 %v435_v62, %v411_v59  ;;  %v462_v57 = vld [vmem:[%s1616_s3 + $0x8] sm:$0xff]  ;;  %v463_v58 = vld [vmem:[%s1616_s3 + $0x10] sm:$0xff]  ;;  %v464_v59 = vld [vmem:[%s1616_s3 + $0x18] sm:$0xff] }
  0xa3   : > { %1218 = vtanh.f32 %v446_v0  ;;  %v425_v8 = vpop.permute.xlu0 %424 }
  0xa4   : > { %1220 = vtanh.f32 %v448_v1  ;;  %v440_v17 = vadd.f32 %v425_v8, %v404_v11  ;;  %v441_v26 = vadd.f32 %v425_v8, %v405_v16  ;;  %v442_v37 = vadd.f32 %v425_v8, %v406_v33  ;;  %v1104_v33 = vld [vmem:[%s1616_s3 + $0x28] sm:$0xff] }
  0xa5   : > { %v348_v12 = vpop.permute.xlu1 %347  ;;  %1222 = vtanh.f32 %v447_v2 }
  0xa6   : > { %v389_v29 = vmul.f32 %v380_v43, %v348_v12  ;;  %v390_v30 = vmul.f32 %v384_v44, %v348_v12  ;;  %v391_v31 = vmul.f32 %v388_v45, %v348_v12  ;;  %1224 = vtanh.f32 %v440_v17 }
  0xa7   : > { %1226 = vtanh.f32 %v441_v26  ;;  %v487_v61 = vpop.permute.xlu0 %486 }
  0xa8   : > { %v401_v38 = vadd.f32 %v389_v29, %v334_v22  ;;  %v402_v39 = vadd.f32 %v390_v30, %v335_v23  ;;  %v403_v40 = vadd.f32 %v391_v31, %v336_v28 }
  0xaa   : > { %v430_v34 = vpop.permute.xlu1 %429 }
  0xab   : > { %v443_v35 = vadd.f32 %v430_v34, %v407_v18  ;;  %v444_v36 = vadd.f32 %v430_v34, %v408_v19  ;;  %v445_v32 = vadd.f32 %v430_v34, %v409_v27  ;;  %v477_v6 = vpop.permute.xlu0 %476  ;;  %v1105_v34 = vld [vmem:[%s1616_s3 + $0x30] sm:$0xff] }
  0xad   : > { %1228 = vtanh.f32 %v443_v35 }
  0xae   : > { %1230 = vtanh.f32 %v444_v36  ;;  %v420_v41 = vpop.permute.xlu1 %419 }
  0xaf   : > { %1232 = vtanh.f32 %v445_v32  ;;  %v437_v42 = vadd.f32 %v420_v41, %v401_v38  ;;  %v438_v46 = vadd.f32 %v420_v41, %v402_v39  ;;  %v439_v43 = vadd.f32 %v420_v41, %v403_v40  ;;  %v1106_v32 = vld [vmem:[%s1616_s3 + $0x38] sm:$0xff] }
  0xb0   : > { %v1219_v44 = vpop.eup %1218  ;;  %1234 = vtanh.f32 %v442_v37 }
  0xb1   : > { %v1221_v45 = vpop.eup %1220  ;;  %1236 = vtanh.f32 %v437_v42 }
  0xb2   : > { %v1223_v47 = vpop.eup %1222  ;;  %1238 = vtanh.f32 %v438_v46  ;;  %1139 = vmatprep.subr.mxu1 %v1221_v45  ;;  %v482_v0 = vpop.permute.xlu1 %481 }
  0xb3   : > { %1240 = vtanh.f32 %v439_v43  ;;  %526 = vmatprep.subr.mxu0 %v1223_v47  ;;  %1140 = vmatpush3.msra.mxu1 %v1221_v45  ;;  %v1225_v48 = vpop.eup %1224  ;;  %v701_v43 = vpop.permute.xlu0 %700 }
  0xb4   : > { %527 = vmatpush1.msra.mxu0 %v1219_v44  ;;  %v1227_v49 = vpop.eup %1226 }
  0xb6   : > { %v472_v11 = vpop.permute.xlu1 %471 }
  0xba   : > { %v1229_v50 = vpop.eup %1228  ;;  %v706_v46 = vpop.permute.xlu1 %705 }
  0xbb   : > { %v1231_v51 = vpop.eup %1230 }
  0xbc   : > { %v1233_v52 = vpop.eup %1232  ;;  %528 = vmatprep.subr.mxu0 %v1231_v51  ;;  %v711_v51 = vpop.permute.xlu0 %710 }
  0xbd   : > { %v1235_v53 = vpop.eup %1234  ;;  %1141 = vmatprep.subr.mxu1 %v1233_v52  ;;  %529 = vmatpush1.msra.mxu0 %v1229_v50 }
  0xbe   : > { %v1237_v54 = vpop.eup %1236  ;;  %1142 = vmatpush3.msra.mxu1 %v1233_v52  ;;  %530 = vmatprep.subr.mxu0 %v1227_v49  ;;  %v716_v50 = vpop.permute.xlu1 %715 }
  0xbf   : > { %v1239_v55 = vpop.eup %1238  ;;  %1143 = vmatprep.subr.mxu1 %v1235_v53  ;;  %531 = vmatpush1.msra.mxu0 %v1225_v48 }
  0xc0   : > { %v1241_v56 = vpop.eup %1240  ;;  %1144 = vmatpush3.msra.mxu1 %v1235_v53  ;;  %532 = vmatprep.subr.mxu0 %v1239_v55 }
  0xc1   : > { %1145 = vmatprep.subr.mxu1 %v1241_v56  ;;  %533 = vmatpush1.msra.mxu0 %v1237_v54 }
  0xc2   : > { %1146 = vmatpush3.msra.mxu1 %v1241_v56  ;;  %1095 = vmatmul.mubr.msk.f32.vlgmr.msra.gmra.mxu0 %vm489_vm0, %v1505_v20  ;;  %v1553_v20 = vld [vmem:[%s1616_s3 + $0x20] sm:$0xff] }
  0xc3   : > { %1148 = vmatmul.mubr.msk.f32.vlgmr.msra.gmra.mxu1 %vm489_vm0, %v462_v57  ;;  %572 = vmatprep.mubr.f32.mxu0 %v1354_v21 }
  0xc4   : > { %1150 = vmatprep.mubr.msk.f32.mxu1 %vm489_vm0, %v463_v58 }
  0xc6   : > { %1096 = vmatmul.mubr.msk.f32.gmra.mxu0 %vm489_vm0, %v462_v57 }
  0xc7   : > { %1151 = vmatmul.mubr.msk.f32.gmra.mxu1 %vm489_vm0, %v464_v59  ;;  %578 = vmatprep.mubr.f32.mxu0 %v1354_v21 }
  0xc8   : > { %794 = vmatprep.mubr.f32.mxu1 %v1354_v21 }
  0xca   : > { %1097 = vmatmul.mubr.msk.f32.gmra.mxu0 %vm489_vm0, %v463_v58 }
  0xcb   : > { %584 = vmatprep.mubr.f32.mxu0 %v1354_v21 }
  0xce   : > { %1098 = vmatmul.mubr.msk.f32.gmra.mxu0 %vm489_vm0, %v464_v59 }
  0xcf   : > { %1161 = vmatprep.mubr.msk.f32.mxu0 %vm489_vm0, %v1553_v20 }
 0x182   : > { %v568_v60 = vpop.f32.mrf.mxu0 }
 0x183   : > { %v1149_v62 = vpop.f32.mrf.mxu1  ;;  %v569_v27 = vadd.f32 %v568_v60, %v472_v11  ;;  %v923_v60 = vpop.permute.xlu0 %922 }
 0x184   : > { %v570_v63 = vpop.f32.mrf.mxu0  ;;  %v663_v8 = vadd.f32 %v1149_v62, %v477_v6 }
 0x185   : > { %v657_v1 = vpop.f32.mrf.mxu1  ;;  %v571_v26 = vadd.f32 %v570_v63, %v472_v11 }
 0x186   : > { %v574_v2 = vpop.f32.mrf.mxu0  ;;  %v658_v12 = vadd.f32 %v657_v1, %v472_v11 }
 0x187   : > { %v1152_v3 = vpop.f32.mrf.mxu1  ;;  %v575_v23 = vadd.f32 %v574_v2, %v477_v6  ;;  %v928_v2 = vpop.permute.xlu1 %927 }
 0x188   : > { %v673_v4 = vadd.f32 %v1152_v3, %v487_v61  ;;  %v576_v5 = vpop.f32.mrf.mxu0 }
 0x189   : > { %v667_v7 = vpop.f32.mrf.mxu1  ;;  %v577_v22 = vadd.f32 %v576_v5, %v477_v6 }
 0x18a   : > { %1242 = vtanh.f32 %v673_v4  ;;  %v668_v9 = vadd.f32 %v667_v7, %v482_v0  ;;  %v580_v10 = vpop.f32.mrf.mxu0 }
 0x18b   : > { %v581_v19 = vadd.f32 %v580_v10, %v482_v0 }
 0x18c   : > { %1244 = vtanh.f32 %v668_v9  ;;  %v582_v13 = vpop.f32.mrf.mxu0  ;;  %v933_v9 = vpop.permute.xlu0 %932 }
 0x18d   : > { %1246 = vtanh.f32 %v663_v8  ;;  %v583_v17 = vadd.f32 %v582_v13, %v482_v0 }
 0x18e   : > { %v586_v14 = vpop.f32.mrf.mxu0  ;;  %1248 = vtanh.f32 %v658_v12 }
 0x18f   : > { %v587_v15 = vadd.f32 %v586_v14, %v487_v61 }
 0x190   : > { %v588_v16 = vpop.f32.mrf.mxu0 }
 0x191   : > { %v589_v18 = vadd.f32 %v588_v16, %v487_v61  ;;  %v938_v16 = vpop.permute.xlu1 %937 }
 0x193   : > { %1250 = vtanh.f32 %v589_v18 }
 0x194   : > { %1252 = vtanh.f32 %v587_v15 }
 0x195   : > { %1254 = vtanh.f32 %v583_v17 }
 0x196   : > { %1256 = vtanh.f32 %v581_v19 }
 0x197   : > { %v1243_v28 = vpop.eup %1242  ;;  %1258 = vtanh.f32 %v577_v22 }
 0x198   : > { %1260 = vtanh.f32 %v575_v23  ;;  %1153 = vmatprep.subr.mxu0 %v1243_v28 }
 0x199   : > { %v1245_v29 = vpop.eup %1244  ;;  %1262 = vtanh.f32 %v571_v26  ;;  %1154 = vmatpush3.msra.mxu0 %v1243_v28 }
 0x19a   : > { %1264 = vtanh.f32 %v569_v27  ;;  %1155 = vmatprep.subr.mxu0 %v1245_v29  ;;  %v1247_v30 = vpop.eup %1246 }
 0x19b   : > { %1156 = vmatpush3.msra.mxu0 %v1245_v29  ;;  %v1249_v31 = vpop.eup %1248 }
 0x19c   : > { %1157 = vmatprep.subr.mxu0 %v1247_v30 }
 0x19d   : > { %1158 = vmatpush3.msra.mxu0 %v1247_v30 }
 0x19e   : > { %1159 = vmatprep.subr.mxu0 %v1249_v31 }
 0x19f   : > { %1160 = vmatpush3.msra.mxu0 %v1249_v31 }
 0x1a0   : > { %v1251_v35 = vpop.eup %1250  ;;  %1162 = vmatmul.mubr.msk.f32.vlgmr.msra.gmra.mxu0 %vm489_vm0, %v1104_v33 }
 0x1a1   : > { %v1253_v36 = vpop.eup %1252  ;;  %754 = vmatprep.subr.mxu1 %v1251_v35  ;;  %1164 = vmatprep.mubr.msk.f32.mxu0 %vm489_vm0, %v1105_v34 }
 0x1a2   : > { %v1255_v37 = vpop.eup %1254  ;;  %755 = vmatpush1.msra.mxu1 %v1253_v36 }
 0x1a3   : > { %v1257_v38 = vpop.eup %1256  ;;  %756 = vmatprep.subr.mxu1 %v1255_v37 }
 0x1a4   : > { %v1259_v39 = vpop.eup %1258  ;;  %1165 = vmatmul.mubr.msk.f32.gmra.mxu0 %vm489_vm0, %v1106_v32  ;;  %757 = vmatpush1.msra.mxu1 %v1257_v38 }
 0x1a5   : > { %v1261_v40 = vpop.eup %1260  ;;  %758 = vmatprep.subr.mxu1 %v1259_v39 }
 0x1a6   : > { %v1263_v41 = vpop.eup %1262  ;;  %759 = vmatpush1.msra.mxu1 %v1261_v40 }
 0x1a7   : > { %v1265_v42 = vpop.eup %1264  ;;  %760 = vmatprep.subr.mxu1 %v1263_v41 }
 0x1a8   : > { %761 = vmatpush1.msra.mxu1 %v1265_v42 }
 0x1a9   : > { %1111 = vmatmul.mubr.msk.f32.vlgmr.msra.gmra.mxu1 %vm489_vm0, %v1553_v20 }
 0x1aa   : > { %800 = vmatprep.mubr.f32.mxu1 %v1354_v21 }
 0x1ad   : > { %1112 = vmatmul.mubr.msk.f32.gmra.mxu1 %vm489_vm0, %v1104_v33 }
 0x1ae   : > { %806 = vmatprep.mubr.f32.mxu1 %v1354_v21 }
 0x1b1   : > { %1113 = vmatmul.mubr.msk.f32.gmra.mxu1 %vm489_vm0, %v1105_v34 }
 0x1b2   : > { %812 = vmatprep.mubr.f32.mxu1 %v1354_v21 }
 0x1b5   : > { %1114 = vmatmul.mubr.msk.f32.gmra.mxu1 %vm489_vm0, %v1106_v32 }
 0x260   : > { %v1163_v44 = vpop.f32.mrf.mxu0 }
 0x261   : > { %v891_v45 = vadd.f32 %v1163_v44, %v706_v46 }
 0x262   : > { %v885_v47 = vpop.f32.mrf.mxu0 }
 0x263   : > { %v886_v48 = vadd.f32 %v885_v47, %v701_v43  ;;  %1266 = vtanh.f32 %v891_v45 }
 0x264   : > { %v1166_v49 = vpop.f32.mrf.mxu0 }
 0x265   : > { %1268 = vtanh.f32 %v886_v48  ;;  %v901_v52 = vadd.f32 %v1166_v49, %v716_v50 }
 0x266   : > { %v895_v53 = vpop.f32.mrf.mxu0 }
 0x267   : > { %v896_v54 = vadd.f32 %v895_v53, %v711_v51 }
 0x269   : > { %1270 = vtanh.f32 %v896_v54  ;;  %v796_v55 = vpop.f32.mrf.mxu1 }
 0x26a   : > { %1272 = vtanh.f32 %v901_v52  ;;  %v797_v56 = vadd.f32 %v796_v55, %v701_v43 }
 0x26b   : > { %v798_v21 = vpop.f32.mrf.mxu1 }
 0x26c   : > { %v799_v59 = vadd.f32 %v798_v21, %v701_v43 }
 0x26d   : > { %v802_v57 = vpop.f32.mrf.mxu1 }
 0x26e   : > { %v803_v58 = vadd.f32 %v802_v57, %v706_v46  ;;  %v1355_v57 = vmov 1966171168  }
 0x26f   : > { %v804_v20 = vpop.f32.mrf.mxu1 }
 0x270   : > { %1274 = vtanh.f32 %v803_v58  ;;  %v805_v61 = vadd.f32 %v804_v20, %v706_v46  ;;  %v1267_v62 = vpop.eup %1266  ;;  %v989_v58 = vunpack.c.l.s4 %v1355_v57 }
 0x271   : > { %1276 = vtanh.f32 %v797_v56  ;;  %v808_v63 = vpop.f32.mrf.mxu1  ;;  %v945_v6 = vmul.f32 %v1267_v62, %v928_v2 }
 0x272   : > { %v1269_v0 = vpop.eup %1268  ;;  %1278 = vtanh.f32 %v805_v61  ;;  %v809_v1 = vadd.f32 %v808_v63, %v711_v51  ;;  %v990_v63 = vunpack.c.0.s8 %v989_v58 }
 0x273   : > { %v942_v3 = vmul.f32 %v1269_v0, %v923_v60  ;;  %1280 = vtanh.f32 %v799_v59  ;;  %v810_v4 = vpop.f32.mrf.mxu1  ;;  %v980_v0 = vstv %s979_s15 }
 0x274   : > { %1282 = vtanh.f32 %v809_v1  ;;  %v811_v5 = vadd.f32 %v810_v4, %v711_v51 }
 0x275   : > { %v814_v7 = vpop.f32.mrf.mxu1  ;;  %v970_v12 = vadd.f32 %v945_v6, %v942_v3 }
 0x276   : > { %v1271_v8 = vpop.eup %1270  ;;  %1284 = vtanh.f32 %v811_v5  ;;  %v815_v10 = vadd.f32 %v814_v7, %v716_v50  ;;  %v993_v5 = vsub.s32 %v990_v63, %v1518_v25 }
 0x277   : > { %v1273_v11 = vpop.eup %1272  ;;  %v948_v13 = vmul.f32 %v1271_v8, %v933_v9  ;;  %v816_v14 = vpop.f32.mrf.mxu1 }
 0x278   : > { %1286 = vtanh.f32 %v815_v10  ;;  %v817_v15 = vadd.f32 %v816_v14, %v716_v50  ;;  %v951_v18 = vmul.f32 %v1273_v11, %v938_v16 }
 0x279   : > { %v971_v17 = vadd.f32 %v970_v12, %v948_v13 }
 0x27a   : > { %1288 = vtanh.f32 %v817_v15 }
 0x27b   : > { %v972_v19 = vadd.f32 %v971_v17, %v951_v18 }
 0x27d   : > { %v1275_v22 = vpop.eup %1274  ;;  %v973_v28 = vrot.slane %v972_v19, 4 }
 0x27e   : > { %v1277_v23 = vpop.eup %1276  ;;  %v943_v29 = vmul.f32 %v1275_v22, %v928_v2 }
 0x27f   : > { %v1279_v26 = vpop.eup %1278  ;;  %v940_v31 = vmul.f32 %v1277_v23, %v923_v60  ;;  %v974_v38 = vadd.f32 %v973_v28, %v972_v19 }
 0x280   : > { %v1281_v27 = vpop.eup %1280  ;;  %v944_v33 = vmul.f32 %v1279_v26, %v928_v2 }
 0x281   : > { %v1283_v30 = vpop.eup %1282  ;;  %v941_v36 = vmul.f32 %v1281_v27, %v923_v60  ;;  %v952_v32 = vadd.f32 %v943_v29, %v940_v31  ;;  %v975_v47 = vrot.slane %v974_v38, 2 }
 0x282   : > { %v946_v34 = vmul.f32 %v1283_v30, %v933_v9 }
 0x283   : > { %v1285_v35 = vpop.eup %1284  ;;  %v961_v40 = vadd.f32 %v944_v33, %v941_v36  ;;  %v976_v52 = vadd.f32 %v975_v47, %v974_v38 }
 0x284   : > { %v947_v37 = vmul.f32 %v1285_v35, %v933_v9  ;;  %v953_v41 = vadd.f32 %v952_v32, %v946_v34 }
 0x285   : > { %v1287_v39 = vpop.eup %1286  ;;  %v977_v56 = vrot.slane %v976_v52, 1 }
 0x286   : > { %v949_v42 = vmul.f32 %v1287_v39, %v938_v16  ;;  %v962_v43 = vadd.f32 %v961_v40, %v947_v37 }
 0x287   : > { %v1289_v46 = vpop.eup %1288  ;;  %v978_v62 = vadd.f32 %v977_v56, %v976_v52 }
 0x288   : > { %v954_v44 = vadd.f32 %v953_v41, %v949_v42  ;;  %v950_v45 = vmul.f32 %v1289_v46, %v938_v16 }
 0x289   : > { %v983_v4 = vadd.f32 %v980_v0, %v978_v62 }
 0x28a   : > { %v955_v48 = vrot.slane %v954_v44, 4  ;;  %v963_v49 = vadd.f32 %v962_v43, %v950_v45 }
 0x28b   : > { %v1001_v8 = vrot.slane %v983_v4, %v993_v5 }
 0x28c   : > { %v956_v50 = vadd.f32 %v955_v48, %v954_v44  ;;  %v964_v51 = vrot.slane %v963_v49, 4 }
 0x28e   : > { %v957_v53 = vrot.slane %v956_v50, 2  ;;  %v965_v54 = vadd.f32 %v964_v51, %v963_v49 }
 0x290   : > { %v966_v55 = vrot.slane %v965_v54, 2  ;;  %v958_v21 = vadd.f32 %v957_v53, %v956_v50 }
 0x292   : > { %v959_v59 = vrot.slane %v958_v21, 1  ;;  %v967_v20 = vadd.f32 %v966_v55, %v965_v54 }
 0x294   : > { %v960_v60 = vadd.f32 %v959_v59, %v958_v21  ;;  %v968_v61 = vrot.slane %v967_v20, 1 }
 0x296   : > { %v969_v1 = vadd.f32 %v968_v61, %v967_v20  ;;  %v981_v2 = vadd.f32 %v980_v0, %v960_v60 }
 0x298   : > { %v982_v3 = vadd.f32 %v980_v0, %v969_v1 }
 0x29a   : > { %v987_v6 = vcombine.low %v981_v2, %v982_v3 }
 0x29c   : > { %v994_v7 = vrot.slane %v987_v6, %v993_v5 }
 0x29e   : > { %v1002_v9 = vcombine.low %v994_v7, %v1001_v8 }
 0x2a0   : > { %v1009_v10 = vrot.slane %v1002_v9, %v993_v5 }
 0x2a2   : > { %1015 = vst.msk [vmem:[%s273_s19] sm:$0x7] %vm1013_vm1, %v1009_v10 }
 0x2a3   : > { %1303 = shalt.err (!%p1300_p3)
}
 0x2a4   : > { %s1304_s10 = scalar_lea.hbm %s1029_s23, 48  ;;  %s1308_s16 = scalar_lea.hbm %s1620_s7, 96 }
 0x2a5   : > { %p1305_p4 = scmp.ne.s32.totalorder %s1029_s23, %s1304_s10  ;;  %p1309_p9 = scmp.lt.s32.totalorder %s1029_s23, %s1620_s7 }
 0x2a6   : > { %p1310_p10 = scmp.lt.s32.totalorder %s1308_s16, %s1304_s10 }
 0x2a7   : > { %p1306_p7 = pnand %p1305_p4, %p1438_p5 }
 0x2a8   : > { %p1311_p11 = por %p1310_p10, %p1309_p9 }
 0x2a9   : > { %p1307_p8 = pneg %p1306_p7 }
 0x2ab   : > { %p1312_p12 = pnand %p1311_p11, %p1307_p8 }
 0x2ad   : > { %1315 = shalt.err (!%p1312_p12)
}
 0x2ae   : > { %1168 = dma.vmem_to_hbm [thread:$0]  (%p1438_p5), %s1032_s20, 48, %s1029_s23, %s1017_s24  }
 0x2af PF: > { %p1174_p13 = scmp.ge.s32.totalorder %s1350_s29, 2  ;;  %s1043_s19 = sand.u32 1, %s1338_s26  }
 0x2b0   : > { %s1044_s21 = scalar_lea.sflag [#allocation4], %s1043_s19 }
 0x2b1   : > { %p1171_p0 = pnand %p1174_p13, %p1442_p6 }
 0x2b3   : > { %p1172_p1 = pneg %p1171_p0 }
 0x2b5   : > { %1333 = dma.done.wait (%p1172_p1), %s1044_s21, 48  }
 0x2b6   : > { %1335 = vsyncadd (%p1172_p1), %s1044_s21, 4294967248  ;;  %p18_p2 = scmp.ge.s32.totalorder %s1425_s8, 4   ;;  %s1623_s26 = smov %s1342_s27 }
 0x2b7   : > { %s1624_s27 = smov %s1346_s28  ;;  %s1625_s28 = smov %s1436_s11 }
 0x2b8   : > { %s1626_s29 = smov %s1425_s8  ;;  %20 = sbr.rel (!%p18_p2) target bundleno = 5 (0x5), region = 85 }
 0x2bd   :  { %1049 = vsyncpa [#allocation4], 1 }
 0x2be   :  { %1051 = vsyncpa [#allocation4 + $0x1], 1 }

</bundles_post_ra>
